<compile_context>
chip_gen: v5e
topology: v5e:2x2
jax: 0.10.0
libtpu: 0.0.40
codegen_flags: <defaults>
</compile_context>

<pallas_src>
import functools
import math

import jax
import jax.numpy as jnp
from jax.experimental import pallas as pl
from jax.experimental.pallas import tpu as pltpu


# ----------------------------------------------------------------------------
# YaRN cache construction (plain JAX / Python — parameter setup, not hot path)
# ----------------------------------------------------------------------------
def _yarn_find_correction_dim(num_rotations, dim, base=10000.0,
                              max_position_embeddings=2048):
    return (dim * math.log(max_position_embeddings /
                           (num_rotations * 2 * math.pi))
            / (2 * math.log(base)))


def _yarn_find_correction_range(low_rot, high_rot, dim, base=10000.0,
                                max_position_embeddings=2048):
    low = math.floor(_yarn_find_correction_dim(low_rot, dim, base,
                                               max_position_embeddings))
    high = math.ceil(_yarn_find_correction_dim(high_rot, dim, base,
                                               max_position_embeddings))
    return max(low, 0), min(high, dim - 1)


def _yarn_linear_ramp_mask(low, high, dim):
    if low == high:
        high += 0.001
    linear_func = (jnp.arange(dim, dtype=jnp.float32) - low) / (high - low)
    return jnp.clip(linear_func, 0.0, 1.0)


def yarn_get_mscale(scale=1.0, mscale=1.0):
    if scale <= 1:
        return 1.0
    return 0.1 * mscale * math.log(scale) + 1.0


def compute_deepseek_cos_sin_cache(rotary_dim, max_position_embeddings, base,
                                   scaling_factor, *, extrapolation_factor=1.0,
                                   attn_factor=1.0, beta_fast=32, beta_slow=1,
                                   mscale=1.0, mscale_all_dim=0.0,
                                   dtype=jnp.float32):
    pos_freqs = base ** (jnp.arange(0, rotary_dim, 2, dtype=jnp.float32)
                         / rotary_dim)
    inv_freq_extrapolation = 1.0 / pos_freqs
    inv_freq_interpolation = 1.0 / (scaling_factor * pos_freqs)
    low, high = _yarn_find_correction_range(beta_fast, beta_slow, rotary_dim,
                                            base, max_position_embeddings)
    inv_freq_mask = ((1.0 - _yarn_linear_ramp_mask(low, high, rotary_dim // 2))
                     * extrapolation_factor)
    inv_freq = (inv_freq_interpolation * (1.0 - inv_freq_mask)
                + inv_freq_extrapolation * inv_freq_mask)
    m = float(yarn_get_mscale(scaling_factor, float(mscale))
              / yarn_get_mscale(scaling_factor, float(mscale_all_dim))
              * attn_factor)
    t = jnp.arange(int(max_position_embeddings * scaling_factor),
                   dtype=jnp.float32)
    freqs = jnp.einsum("i,j->ij", t, inv_freq)
    cos = jnp.cos(freqs) * m
    sin = jnp.sin(freqs) * m
    cache = jnp.concatenate([cos, sin], axis=-1)  # [max_len, rotary_dim]
    return cache.astype(dtype)


# ----------------------------------------------------------------------------
# Small helpers
# ----------------------------------------------------------------------------
def _round_up(x, m):
    return -(-x // m) * m


def _vmem_capacity_bytes():
    try:
        return int(pltpu.get_tpu_info().vmem_capacity_bytes)
    except Exception:
        return 64 * 2**20  # conservative default (v7x per-TensorCore VMEM)


@functools.lru_cache(maxsize=None)
def _probe_roll(lane_width):
    """Probe pltpu.roll on a rank-3 lane roll of this width.

    Returns (use_hw_roll, np_roll_convention) where np_roll_convention means
    pltpu.roll(x, s, axis)[j] == x[(j - s) % n] (same as np.roll).
    """
    def probe(x_ref, o_ref):
        o_ref[...] = pltpu.roll(x_ref[...], 1, 2)

    x = jnp.arange(2 * 8 * lane_width, dtype=jnp.float32).reshape(
        2, 8, lane_width)
    try:
        out = pl.pallas_call(
            probe,
            out_shape=jax.ShapeDtypeStruct((2, 8, lane_width), jnp.float32),
        )(x)
        out = jax.device_get(out)
    except Exception:
        return False, True
    return True, bool(float(out[0, 0, 1]) == 0.0)


# ----------------------------------------------------------------------------
# Pallas kernel: rotary rotation of query & key (hot path)
# ----------------------------------------------------------------------------
def _rope_kernel(cos_ref, sfwd_ref, sbwd_ref, q_ref, k_ref, qo_ref, ko_ref, *,
                 shift_fwd, shift_bwd, use_hw_roll):
    # Coefficients: [tile, Df] f32, sign + half/pair selection pre-baked.
    # out[j] = x[j]*cos[j] + x[j+h]*sin_fwd[j] + x[j-h]*sin_bwd[j]
    cos = cos_ref[...][:, None, :]        # broadcast over the head sublanes
    s_fwd = sfwd_ref[...][:, None, :]
    s_bwd = sbwd_ref[...][:, None, :]

    def lane_roll(x, shift):
        if use_hw_roll:
            return pltpu.roll(x, shift, 2)     # XLU slot — essentially free
        # Fallback: jnp.roll lowers to slice+concat (lane relayout copies,
        # still a single full-width store afterwards).
        return jnp.roll(x, shift, axis=2)

    def apply(x_ref, o_ref):
        x = x_ref[...].astype(jnp.float32)     # [tile, Hf, Df], f32 compute
        x_fwd = lane_roll(x, shift_fwd)        # x[.., (j + h) % Df]
        x_bwd = lane_roll(x, shift_bwd)        # x[.., (j - h) % Df]
        o_ref[...] = (x * cos + x_fwd * s_fwd + x_bwd * s_bwd).astype(
            o_ref.dtype)                       # ONE lane-dense store

    apply(q_ref, qo_ref)
    apply(k_ref, ko_ref)


def _choose_token_tile(T, hq, hk, df, izq, izk, io_budget_bytes):
    """Largest token tile whose double-buffered working set (padded layout,
    plus f32 temporaries) fits the I/O budget."""
    dfp = _round_up(df, 128)
    hq8, hk8 = _round_up(hq, 8), _round_up(hk, 8)
    q_tok = hq8 * dfp * izq
    k_tok = hk8 * dfp * izk
    cs_tok = 3 * dfp * 4
    tmp_tok = (4 * max(hq8, hk8) + 3 * 8) * dfp * 4   # f32 intermediates
    per_tok = 2 * (2 * q_tok + 2 * k_tok + cs_tok) + tmp_tok
    tile = int(io_budget_bytes // max(per_tok, 1))
    tile = max(8, min(tile, 2048))
    tile = (tile // 8) * 8
    # TODO(synk): on v7x (2 TensorCores) cap tile at ceil(T/2) so the
    # "parallel" token axis can shard across both cores; needs a reliable
    # per-chip core-count query.
    return max(1, min(tile, T))


def apply_rope_pallas(cos_f, sin_fwd, sin_bwd, q, k, *, neighbor,
                      token_tile=None):
    """q: [T, Hq, Df], k: [T, Hk, Df] (lane-folded); coeffs: [T, Df] f32."""
    T, hq, df = q.shape
    hk = k.shape[1]
    assert cos_f.shape == (T, df) and sin_fwd.shape == (T, df)
    assert 0 < neighbor < df

    cap = _vmem_capacity_bytes()
    io_budget = min(max(cap // 3, 16 * 2**20), 64 * 2**20)
    vmem_limit = max(min(cap * 3 // 4, 100 * 2**20), 32 * 2**20)

    if token_tile is None:
        token_tile = _choose_token_tile(
            T, hq, hk, df,
            jnp.dtype(q.dtype).itemsize, jnp.dtype(k.dtype).itemsize,
            io_budget)

    use_hw_roll, np_like = _probe_roll(df)
    if use_hw_roll and not np_like:
        shift_fwd, shift_bwd = neighbor, df - neighbor
    else:
        shift_fwd, shift_bwd = df - neighbor, neighbor

    kern = functools.partial(_rope_kernel, shift_fwd=shift_fwd,
                             shift_bwd=shift_bwd, use_hw_roll=use_hw_roll)

    cs_spec = pl.BlockSpec((token_tile, df), lambda i: (i, 0))
    q_spec = pl.BlockSpec((token_tile, hq, df), lambda i: (i, 0, 0))
    k_spec = pl.BlockSpec((token_tile, hk, df), lambda i: (i, 0, 0))

    return pl.pallas_call(
        kern,
        out_shape=(jax.ShapeDtypeStruct(q.shape, q.dtype),
                   jax.ShapeDtypeStruct(k.shape, k.dtype)),
        grid=(pl.cdiv(T, token_tile),),
        in_specs=[cs_spec, cs_spec, cs_spec, q_spec, k_spec],
        out_specs=(q_spec, k_spec),
        input_output_aliases={3: 0, 4: 1},       # RoPE is in-place: q->qo, k->ko
        compiler_params=pltpu.CompilerParams(
            dimension_semantics=("parallel",),
            vmem_limit_bytes=int(vmem_limit)),
    )(cos_f, sin_fwd, sin_bwd, q, k)


# ----------------------------------------------------------------------------
# Module-equivalent wrapper
# ----------------------------------------------------------------------------
class DeepseekScalingRotaryEmbeddingPallas:
    def __init__(self, head_size, rotary_dim, max_position_embeddings, base,
                 is_neox_style, scaling_factor, dtype=jnp.float32, *,
                 extrapolation_factor=1.0, attn_factor=1.0, beta_fast=32,
                 beta_slow=1, mscale=1.0, mscale_all_dim=0.0):
        assert rotary_dim % 2 == 0 and rotary_dim <= head_size
        self.head_size = head_size
        self.rotary_dim = rotary_dim
        self.is_neox_style = is_neox_style
        self.dtype = dtype
        self.cos_sin_cache = compute_deepseek_cos_sin_cache(
            rotary_dim, max_position_embeddings, base, scaling_factor,
            extrapolation_factor=extrapolation_factor,
            attn_factor=attn_factor, beta_fast=beta_fast, beta_slow=beta_slow,
            mscale=mscale, mscale_all_dim=mscale_all_dim, dtype=dtype)
        self._build_expanded_caches()

    def _build_expanded_caches(self):
        # Per-lane coefficient caches over the full head_size: sign + the
        # half (neox) / pair (gptj) selection are baked in, passthrough lanes
        # get cos=1, sin=0 -> the kernel does one full-width FMA + store.
        rd, d = self.rotary_dim, self.head_size
        rh = rd // 2
        cs = self.cos_sin_cache.astype(jnp.float32)
        cos, sin = cs[:, :rh], cs[:, rh:]
        n = cs.shape[0]
        ones_pad = jnp.ones((n, d - rd), jnp.float32)
        zeros_pad = jnp.zeros((n, d - rd), jnp.float32)
        zeros_h = jnp.zeros_like(sin)
        if self.is_neox_style:
            # out[:rh]   = x1*cos - x2*sin   (fwd neighbor at +rh)
            # out[rh:rd] = x2*cos + x1*sin   (bwd neighbor at -rh)
            self._neighbor = rh
            self._cos_e = jnp.concatenate([cos, cos, ones_pad], axis=-1)
            self._sin_fwd = jnp.concatenate([-sin, zeros_h, zeros_pad], axis=-1)
            self._sin_bwd = jnp.concatenate([zeros_h, sin, zeros_pad], axis=-1)
        else:
            # GPT-J interleaved: pairs (2i, 2i+1); neighbor at +/-1.
            self._neighbor = 1
            cos_i = jnp.repeat(cos, 2, axis=-1)
            sin_i = jnp.repeat(sin, 2, axis=-1)
            even = (jnp.arange(rd) % 2) == 0
            self._cos_e = jnp.concatenate([cos_i, ones_pad], axis=-1)
            self._sin_fwd = jnp.concatenate(
                [jnp.where(even, -sin_i, 0.0), zeros_pad], axis=-1)
            self._sin_bwd = jnp.concatenate(
                [jnp.where(even, 0.0, sin_i), zeros_pad], axis=-1)

    def __call__(self, positions, query, key, offsets=None):
        # positions: [B, S] int32; query: [B, S, Hq, D]; key: [B, S, Hk, D]
        if offsets is not None:
            positions = positions + offsets
        pos = positions.reshape(-1)
        t = pos.shape[0]
        d = self.head_size
        q = query.reshape(t, -1, d)
        k = key.reshape(t, -1, d)
        hq, hk = q.shape[1], k.shape[1]

        # TODO(synk): fuse this gather into the kernel (scalar-prefetched
        # positions + pl.Element row gather) to save one [T, head_size] f32
        # HBM round trip at decode shapes.
        cos_f = jnp.take(self._cos_e, pos, axis=0)
        sin_fwd = jnp.take(self._sin_fwd, pos, axis=0)
        sin_bwd = jnp.take(self._sin_bwd, pos, axis=0)

        # Fold adjacent heads into the lane dim (free contiguous reshape) so
        # the kernel blocks and stores are >=128 lanes wide.
        fold = 1
        while d * fold < 128 and hq % (2 * fold) == 0 and hk % (2 * fold) == 0:
            fold *= 2
        if fold > 1:
            q = q.reshape(t, hq // fold, fold * d)
            k = k.reshape(t, hk // fold, fold * d)
            cos_f = jnp.tile(cos_f, (1, fold))
            sin_fwd = jnp.tile(sin_fwd, (1, fold))
            sin_bwd = jnp.tile(sin_bwd, (1, fold))

        # TODO(synk): optional bf16 compute path for bf16 inputs on v6e/v7x
        # (kernel currently computes in f32, which v5e requires anyway).
        qo, ko = apply_rope_pallas(cos_f, sin_fwd, sin_bwd, q, k,
                                   neighbor=self._neighbor)
        return qo.reshape(query.shape), ko.reshape(key.shape)


# ----------------------------------------------------------------------------
# Pure-JAX reference (mirrors the PyTorch forward) for verification
# ----------------------------------------------------------------------------
def _reference_forward(cache, positions, query, key, rotary_dim, head_size,
                       is_neox_style):
    query_rot = query[..., :rotary_dim]
    key_rot = key[..., :rotary_dim]
    cos_sin = cache[positions].astype(jnp.float32)   # [B, S, rotary_dim]
    cos, sin = jnp.split(cos_sin, 2, axis=-1)
    if is_neox_style:
        cos = jnp.tile(cos, (1, 1, 2))[..., None, :]
        sin = jnp.tile(sin, (1, 1, 2))[..., None, :]

        def rotate(x):
            x1, x2 = jnp.split(x, 2, axis=-1)
            return jnp.concatenate([-x2, x1], axis=-1)
    else:
        cos = jnp.repeat(cos, 2, axis=-1)[..., None, :]
        sin = jnp.repeat(sin, 2, axis=-1)[..., None, :]

        def rotate(x):
            x1 = x[..., ::2]
            x2 = x[..., 1::2]
            return jnp.stack([-x2, x1], axis=-1).reshape(x.shape)

    query_rot = query_rot * cos + rotate(query_rot) * sin
    key_rot = key_rot * cos + rotate(key_rot) * sin
    if rotary_dim < head_size:
        query = jnp.concatenate([query_rot, query[..., rotary_dim:]], axis=-1)
        key = jnp.concatenate([key_rot, key[..., rotary_dim:]], axis=-1)
    else:
        query, key = query_rot, key_rot
    return query, key


def _run_case(name, B, S, Hq, Hk, head_size, rotary_dim, max_pos, base,
              scaling_factor, is_neox_style, seed):
    rope = DeepseekScalingRotaryEmbeddingPallas(
        head_size, rotary_dim, max_pos, base, is_neox_style, scaling_factor,
        dtype=jnp.float32)
    key0 = jax.random.PRNGKey(seed)
    kp, kq, kk = jax.random.split(key0, 3)
    cache_len = int(max_pos * scaling_factor)
    positions = jax.random.randint(kp, (B, S), 0, cache_len, dtype=jnp.int32)
    query = jax.random.normal(kq, (B, S, Hq, head_size), dtype=jnp.float32)
    key_t = jax.random.normal(kk, (B, S, Hk, head_size), dtype=jnp.float32)

    # Reference first (kernel aliases q/k, keep the check order conservative).
    q_ref, k_ref = _reference_forward(rope.cos_sin_cache, positions, query,
                                      key_t, rotary_dim, head_size,
                                      is_neox_style)

    q_out, k_out = rope(positions, query, key_t)
    jax.block_until_ready((q_out, k_out))

    assert q_out.shape == query.shape and k_out.shape == key_t.shape, name
    assert jnp.allclose(q_out, q_ref, atol=1e-5, rtol=1e-5), name
    assert jnp.allclose(k_out, k_ref, atol=1e-5, rtol=1e-5), name


if __name__ == "__main__":
    # Case 1: neox, rotary_dim < head_size (passthrough lanes), head folding.
    _run_case("neox_passthrough", B=2, S=8, Hq=4, Hk=4, head_size=64,
              rotary_dim=32, max_pos=16, base=10000, scaling_factor=4.0,
              is_neox_style=True, seed=0)
    # Case 2: neox, rotary_dim == head_size, T not a multiple of 8 (ragged
    # last block), different q/k head counts.
    _run_case("neox_full_ragged", B=2, S=5, Hq=4, Hk=2, head_size=64,
              rotary_dim=64, max_pos=16, base=10000, scaling_factor=4.0,
              is_neox_style=True, seed=0)
    # Case 3: GPT-J interleaved style.
    _run_case("gptj_full", B=1, S=7, Hq=2, Hk=2, head_size=64,
              rotary_dim=64, max_pos=16, base=10000, scaling_factor=4.0,
              is_neox_style=False, seed=0)
    print("KERNEL_OK")
</pallas_src>

<mosaic_0001>
module attributes {stable_mosaic.version = 11 : i64} {
  func.func @probe(%arg0: memref<2x8x128xf32, #tpu.memory_space<vmem>>, %arg1: memref<2x8x128xf32, #tpu.memory_space<vmem>>) attributes {dimension_semantics = [], scalar_prefetch = 0 : i64, scratch_operands = 0 : i64, tpu.core_type = #tpu.core_type<tc>} {
    %c0 = arith.constant 0 : index
    %c0_0 = arith.constant 0 : index
    %c0_1 = arith.constant 0 : index
    %0 = vector.load %arg0[%c0, %c0_0, %c0_1] : memref<2x8x128xf32, #tpu.memory_space<vmem>>, vector<2x8x128xf32>
    %c1_i32 = arith.constant 1 : i32
    %1 = tpu.dynamic_rotate %0 by %c1_i32 dim 2 : vector<2x8x128xf32>, i32 -> vector<2x8x128xf32>
    %c0_2 = arith.constant 0 : index
    %c0_3 = arith.constant 0 : index
    %c0_4 = arith.constant 0 : index
    %2 = vector.load %arg1[%c0_2, %c0_3, %c0_4] : memref<2x8x128xf32, #tpu.memory_space<vmem>>, vector<2x8x128xf32>
    tpu.vector_store %arg1[%c0_2, %c0_3, %c0_4], %1 {strides = array<i32>} : memref<2x8x128xf32, #tpu.memory_space<vmem>>, vector<2x8x128xf32>,
    return
  }
}

module attributes {stable_mosaic.version = 11 : i64} {
  func.func @_rope_kernel(%arg0: i32, %arg1: memref<16x128xf32, #tpu.memory_space<vmem>>, %arg2: memref<16x128xf32, #tpu.memory_space<vmem>>, %arg3: memref<16x128xf32, #tpu.memory_space<vmem>>, %arg4: memref<16x2x128xf32, #tpu.memory_space<vmem>>, %arg5: memref<16x2x128xf32, #tpu.memory_space<vmem>>, %arg6: memref<16x2x128xf32, #tpu.memory_space<vmem>>, %arg7: memref<16x2x128xf32, #tpu.memory_space<vmem>>) attributes {dimension_semantics = [#tpu.dimension_semantics<parallel>], iteration_bounds = array<i64: 1>, scalar_prefetch = 0 : i64, scratch_operands = 0 : i64, tpu.core_type = #tpu.core_type<tc>, window_params = [{transform_indices = @transform_0, window_bounds = array<i64: 16, 128>}, {transform_indices = @transform_1, window_bounds = array<i64: 16, 128>}, {transform_indices = @transform_2, window_bounds = array<i64: 16, 128>}, {transform_indices = @transform_3, window_bounds = array<i64: 16, 2, 128>}, {transform_indices = @transform_4, window_bounds = array<i64: 16, 2, 128>}, {transform_indices = @transform_5, window_bounds = array<i64: 16, 2, 128>}, {transform_indices = @transform_6, window_bounds = array<i64: 16, 2, 128>}]} {
    %c0 = arith.constant 0 : index
    %c0_0 = arith.constant 0 : index
    %0 = vector.load %arg1[%c0, %c0_0] : memref<16x128xf32, #tpu.memory_space<vmem>>, vector<16x128xf32>
    %1 = vector.shape_cast %0 : vector<16x128xf32> to vector<16x1x128xf32>
    %c0_1 = arith.constant 0 : index
    %c0_2 = arith.constant 0 : index
    %2 = vector.load %arg2[%c0_1, %c0_2] : memref<16x128xf32, #tpu.memory_space<vmem>>, vector<16x128xf32>
    %3 = vector.shape_cast %2 : vector<16x128xf32> to vector<16x1x128xf32>
    %c0_3 = arith.constant 0 : index
    %c0_4 = arith.constant 0 : index
    %4 = vector.load %arg3[%c0_3, %c0_4] : memref<16x128xf32, #tpu.memory_space<vmem>>, vector<16x128xf32>
    %5 = vector.shape_cast %4 : vector<16x128xf32> to vector<16x1x128xf32>
    %c0_5 = arith.constant 0 : index
    %c0_6 = arith.constant 0 : index
    %c0_7 = arith.constant 0 : index
    %6 = vector.load %arg4[%c0_5, %c0_6, %c0_7] : memref<16x2x128xf32, #tpu.memory_space<vmem>>, vector<16x2x128xf32>
    %7 = vector.extract_strided_slice %6 {offsets = [0, 0, 16], sizes = [16, 2, 112], strides = [1, 1, 1]} : vector<16x2x128xf32> to vector<16x2x112xf32>
    %8 = vector.extract_strided_slice %6 {offsets = [0, 0, 0], sizes = [16, 2, 16], strides = [1, 1, 1]} : vector<16x2x128xf32> to vector<16x2x16xf32>
    %9 = tpu.concatenate %7, %8 in 2 : vector<16x2x112xf32>, vector<16x2x16xf32> -> vector<16x2x128xf32>
    %10 = vector.extract_strided_slice %6 {offsets = [0, 0, 112], sizes = [16, 2, 16], strides = [1, 1, 1]} : vector<16x2x128xf32> to vector<16x2x16xf32>
    %11 = vector.extract_strided_slice %6 {offsets = [0, 0, 0], sizes = [16, 2, 112], strides = [1, 1, 1]} : vector<16x2x128xf32> to vector<16x2x112xf32>
    %12 = tpu.concatenate %10, %11 in 2 : vector<16x2x16xf32>, vector<16x2x112xf32> -> vector<16x2x128xf32>
    %13 = vector.broadcast %1 : vector<16x1x128xf32> to vector<16x2x128xf32>
    %14 = arith.mulf %6, %13 : vector<16x2x128xf32>
    %15 = vector.broadcast %3 : vector<16x1x128xf32> to vector<16x2x128xf32>
    %16 = arith.mulf %9, %15 : vector<16x2x128xf32>
    %17 = arith.addf %14, %16 : vector<16x2x128xf32>
    %18 = vector.broadcast %5 : vector<16x1x128xf32> to vector<16x2x128xf32>
    %19 = arith.mulf %12, %18 : vector<16x2x128xf32>
    %20 = arith.addf %17, %19 : vector<16x2x128xf32>
    %c0_8 = arith.constant 0 : index
    %c0_9 = arith.constant 0 : index
    %c0_10 = arith.constant 0 : index
    %21 = vector.load %arg6[%c0_8, %c0_9, %c0_10] : memref<16x2x128xf32, #tpu.memory_space<vmem>>, vector<16x2x128xf32>
    tpu.vector_store %arg6[%c0_8, %c0_9, %c0_10], %20 {strides = array<i32>} : memref<16x2x128xf32, #tpu.memory_space<vmem>>, vector<16x2x128xf32>,
    %c0_11 = arith.constant 0 : index
    %c0_12 = arith.constant 0 : index
    %c0_13 = arith.constant 0 : index
    %22 = vector.load %arg5[%c0_11, %c0_12, %c0_13] : memref<16x2x128xf32, #tpu.memory_space<vmem>>, vector<16x2x128xf32>
    %23 = vector.extract_strided_slice %22 {offsets = [0, 0, 16], sizes = [16, 2, 112], strides = [1, 1, 1]} : vector<16x2x128xf32> to vector<16x2x112xf32>
    %24 = vector.extract_strided_slice %22 {offsets = [0, 0, 0], sizes = [16, 2, 16], strides = [1, 1, 1]} : vector<16x2x128xf32> to vector<16x2x16xf32>
    %25 = tpu.concatenate %23, %24 in 2 : vector<16x2x112xf32>, vector<16x2x16xf32> -> vector<16x2x128xf32>
    %26 = vector.extract_strided_slice %22 {offsets = [0, 0, 112], sizes = [16, 2, 16], strides = [1, 1, 1]} : vector<16x2x128xf32> to vector<16x2x16xf32>
    %27 = vector.extract_strided_slice %22 {offsets = [0, 0, 0], sizes = [16, 2, 112], strides = [1, 1, 1]} : vector<16x2x128xf32> to vector<16x2x112xf32>
    %28 = tpu.concatenate %26, %27 in 2 : vector<16x2x16xf32>, vector<16x2x112xf32> -> vector<16x2x128xf32>
    %29 = vector.broadcast %1 : vector<16x1x128xf32> to vector<16x2x128xf32>
    %30 = arith.mulf %22, %29 : vector<16x2x128xf32>
    %31 = vector.broadcast %3 : vector<16x1x128xf32> to vector<16x2x128xf32>
    %32 = arith.mulf %25, %31 : vector<16x2x128xf32>
    %33 = arith.addf %30, %32 : vector<16x2x128xf32>
    %34 = vector.broadcast %5 : vector<16x1x128xf32> to vector<16x2x128xf32>
    %35 = arith.mulf %28, %34 : vector<16x2x128xf32>
    %36 = arith.addf %33, %35 : vector<16x2x128xf32>
    %c0_14 = arith.constant 0 : index
    %c0_15 = arith.constant 0 : index
    %c0_16 = arith.constant 0 : index
    %37 = vector.load %arg7[%c0_14, %c0_15, %c0_16] : memref<16x2x128xf32, #tpu.memory_space<vmem>>, vector<16x2x128xf32>
    tpu.vector_store %arg7[%c0_14, %c0_15, %c0_16], %36 {strides = array<i32>} : memref<16x2x128xf32, #tpu.memory_space<vmem>>, vector<16x2x128xf32>,
    return
  }
  func.func @transform_0(%arg0: i32) -> (i32, i32) {
    %c0_i32 = arith.constant 0 : i32
    %c0_i32_0 = arith.constant 0 : i32
    return %arg0, %c0_i32 : i32, i32
  }
  func.func @transform_1(%arg0: i32) -> (i32, i32) {
    %c0_i32 = arith.constant 0 : i32
    %c0_i32_0 = arith.constant 0 : i32
    return %arg0, %c0_i32 : i32, i32
  }
  func.func @transform_2(%arg0: i32) -> (i32, i32) {
    %c0_i32 = arith.constant 0 : i32
    %c0_i32_0 = arith.constant 0 : i32
    return %arg0, %c0_i32 : i32, i32
  }
  func.func @transform_3(%arg0: i32) -> (i32, i32, i32) {
    %c0_i32 = arith.constant 0 : i32
    %c0_i32_0 = arith.constant 0 : i32
    %c0_i32_1 = arith.constant 0 : i32
    return %arg0, %c0_i32, %c0_i32_0 : i32, i32, i32
  }
  func.func @transform_4(%arg0: i32) -> (i32, i32, i32) {
    %c0_i32 = arith.constant 0 : i32
    %c0_i32_0 = arith.constant 0 : i32
    %c0_i32_1 = arith.constant 0 : i32
    return %arg0, %c0_i32, %c0_i32_0 : i32, i32, i32
  }
  func.func @transform_5(%arg0: i32) -> (i32, i32, i32) {
    %c0_i32 = arith.constant 0 : i32
    %c0_i32_0 = arith.constant 0 : i32
    %c0_i32_1 = arith.constant 0 : i32
    return %arg0, %c0_i32, %c0_i32_0 : i32, i32, i32
  }
  func.func @transform_6(%arg0: i32) -> (i32, i32, i32) {
    %c0_i32 = arith.constant 0 : i32
    %c0_i32_0 = arith.constant 0 : i32
    %c0_i32_1 = arith.constant 0 : i32
    return %arg0, %c0_i32, %c0_i32_0 : i32, i32, i32
  }
}

</mosaic_0001>

<bundles_post_ra>
// kernel: tpu_custom_call.1
= control target key start
LH: loop header
LB: loop body
LE: loop exit
PB: predicated region body
PF: predicated region fallthrough
CT: control target
= control target key end

     0   :  { %6 = vsyncpa [#allocation3], 0  ;;  %s130_s0 = inlined_call_operand.hbm [shape: f32[2,8,128], index: 0, kind: input, shape index: {}]   ;;  %s131_s1 = inlined_call_operand.hbm [shape: f32[2,8,128], index: 1, kind: output, shape index: {}]  }
   0x1   :  { %7 = vsyncpa [#allocation4], 0  ;;  %s12_s8 = sshll.u32 %s130_s0, 4  ;;  %s109_s9 = smov [#allocation2]   ;;  %s13_s8 = int_to_ptr.hbm [resolvable:$true] %s12_s8 }
   0x2   :  { %s14_s10 = sshll.u32 %s109_s9, 4  ;;  %s110_s11 = smov 128   ;;  %s15_s10 = int_to_ptr.vmem [resolvable:$true] %s14_s10 }
   0x3   :  { %s111_s12 = smov 8  }
   0x4   :  { %20 = dma.hbm_to_vmem [thread:$0]  %s13_s8, 256, %s15_s10, [#allocation3], %s110_s11, %s110_s11, %s111_s12  }
   0x5   :  { %105 = dma.done.wait [#allocation3], 256  }
   0x6   :  { %106 = vsyncadd [#allocation3], 4294967040  ;;  %v25_v0 = vld [vmem:[#allocation2] sm:$0xff]  ;;  %s112_s13 = smov 1   ;;  %v26_v1 = vld [vmem:[#allocation2 + $0x8] sm:$0xff]  ;;  %s113_s14 = smov [#allocation5]  }
   0x7   :  { %27 = vrot.lane.b32.xlu0 %v25_v0, %s112_s13  ;;  %s37_s15 = sshll.u32 %s113_s14, 4  ;;  %s39_s17 = sshll.u32 %s131_s1, 4  ;;  %s38_s15 = int_to_ptr.vmem [resolvable:$true] %s37_s15  ;;  %s40_s17 = int_to_ptr.hbm [resolvable:$true] %s39_s17 }
   0xf   :  { %29 = vrot.lane.b32.xlu0 %v26_v1, %s112_s13 }
  0x79   :  { %v28_v2 = vpop.permute.xlu0 %27 }
  0x7a   :  { %31 = vst [vmem:[#allocation5] sm:$0xff] %v28_v2 }
  0x81   :  { %v30_v3 = vpop.permute.xlu0 %29 }
  0x82   :  { %32 = vst [vmem:[#allocation5 + $0x8] sm:$0xff] %v30_v3 }
  0x83   :  { %45 = dma.vmem_to_hbm [thread:$0]  %s38_s15, 256, %s40_s17, [#allocation4], %s110_s11, %s110_s11, %s111_s12  }
  0x84   :  { %107 = dma.done.wait [#allocation4], 256  }
  0x85   :  { %108 = vsyncadd [#allocation4], 4294967040 }
  0x86   :  { %50 = vsyncpa [#allocation3], 1 }
  0x87   :  { %51 = vsyncpa [#allocation4], 1 }

// kernel: tpu_custom_call.1
= control target key start
LH: loop header
LB: loop body
LE: loop exit
PB: predicated region body
PF: predicated region fallthrough
CT: control target
= control target key end

     0   :  { %12 = vsyncpa [#allocation3], 0  ;;  %s1415_s0 = inlined_call_operand.vmem [shape: f32[16,128], index: 0, kind: input, shape index: {}]   ;;  %s1416_s1 = inlined_call_operand.vmem [shape: f32[16,128], index: 1, kind: input, shape index: {}]   ;;  %s1417_s2 = inlined_call_operand.vmem [shape: f32[16,128], index: 2, kind: input, shape index: {}]   ;;  %s1418_s3 = inlined_call_operand.hbm [shape: f32[16,2,128], index: 3, kind: input, shape index: {}, may-alias: {3,5}]   ;;  %s1419_s4 = inlined_call_operand.hbm [shape: f32[16,2,128], index: 4, kind: input, shape index: {}, may-alias: {4,6}]   ;;  %s1420_s5 = inlined_call_operand.hbm [shape: f32[16,2,128], index: 5, kind: output, shape index: {0}, may-alias: {3,5}]   ;;  %s1421_s6 = inlined_call_operand.hbm [shape: f32[16,2,128], index: 6, kind: output, shape index: {1}, may-alias: {4,6}]  }
   0x1   :  { %13 = vsyncpa [#allocation6], 0 }
   0x2   :  { %14 = vsyncpa [#allocation4], 0 }
   0x3   :  { %15 = vsyncpa [#allocation9], 0  ;;  %s26_s23 = sshll.u32 %s1418_s3, 4  ;;  %s804_s24 = smov [#allocation2]   ;;  %s27_s23 = int_to_ptr.hbm [resolvable:$true] %s26_s23 }
   0x4   :  { %s28_s25 = sshll.u32 %s804_s24, 4  ;;  %s39_s28 = sshll.u32 %s1419_s4, 4  ;;  %s29_s25 = int_to_ptr.vmem [resolvable:$true] %s28_s25  ;;  %s40_s28 = int_to_ptr.hbm [resolvable:$true] %s39_s28 }
   0x5   :  { %s805_s29 = smov 32   ;;  %s806_s30 = smov 2  }
   0x6   :  { %34 = dma.hbm_to_vmem [thread:$0]  %s27_s23, 512, %s29_s25, [#allocation3], %s805_s29, %s805_s29, %s806_s30  }
   0x7   :  { %s807_s7 = smov [#allocation5]  }
   0x8   :  { %s41_s8 = sshll.u32 %s807_s7, 4  ;;  %s42_s8 = int_to_ptr.vmem [resolvable:$true] %s41_s8 }
   0x9   :  { %47 = dma.hbm_to_vmem [thread:$0]  %s40_s28, 512, %s42_s8, [#allocation6], %s805_s29, %s805_s29, %s806_s30  }
   0xa   :  { %796 = dma.done.wait [#allocation3], 512  }
   0xb   :  { %797 = vsyncadd [#allocation3], 4294966784 }
   0xc   :  { %798 = dma.done.wait [#allocation6], 512  }
   0xd   :  { %799 = vsyncadd [#allocation6], 4294966784  ;;  %v859_v0 = vld [vmem:[#allocation2 + $0x8] sm:$0x3]  ;;  %v861_v1 = vld [vmem:[#allocation2 + $0x4] sm:$0x3] }
   0xe   :  { %s808_s3 = smov 112   ;;  %v867_v2 = vld [vmem:[#allocation2] sm:$0x3]  ;;  %v871_v3 = vld [vmem:[#allocation2 + $0xa] sm:$0x3]  ;;  %s809_s4 = smov 16  }
   0xf   :  { %150 = vrot.lane.b32.xlu2 %v859_v0, %s808_s3  ;;  %146 = vrot.lane.b32.xlu1 %v861_v1, %s808_s3  ;;  %v873_v4 = vld [vmem:[#allocation2 + $0x6] sm:$0x3]  ;;  %v875_v5 = vld [vmem:[#allocation2 + $0x2] sm:$0x3]  ;;  %v883_v6 = vld [vmem:[#allocation2 + $0x10] sm:$0x3] }
  0x10   :  { %142 = vrot.lane.b32.xlu0 %v867_v2, %s808_s3  ;;  %v885_v7 = vld [vmem:[#allocation2 + $0xe] sm:$0x3]  ;;  %v887_v8 = vld [vmem:[#allocation2 + $0xc] sm:$0x3]  ;;  %v895_v9 = vld [vmem:[#allocation2 + $0x16] sm:$0x3] }
  0x11   :  { %v897_v10 = vld [vmem:[#allocation2 + $0x14] sm:$0x3]  ;;  %v899_v11 = vld [vmem:[#allocation2 + $0x12] sm:$0x3]  ;;  %v907_v12 = vld [vmem:[#allocation2 + $0x1c] sm:$0x3] }
  0x12   :  { %v909_v13 = vld [vmem:[#allocation2 + $0x1a] sm:$0x3]  ;;  %v911_v14 = vld [vmem:[#allocation2 + $0x18] sm:$0x3]  ;;  %v919_v15 = vld [vmem:[#allocation2 + $0x1e] sm:$0x3] }
  0x13   :  { %v951_v16 = vld [vmem:[#allocation5] sm:$0x3]  ;;  %v959_v17 = vld [vmem:[#allocation5 + $0x6] sm:$0x3]  ;;  %v961_v18 = vld [vmem:[#allocation5 + $0x4] sm:$0x3] }
  0x14   :  { %v963_v19 = vld [vmem:[#allocation5 + $0x2] sm:$0x3]  ;;  %v987_v26 = vld [vmem:[#allocation5 + $0xc] sm:$0x3]  ;;  %v989_v27 = vld [vmem:[#allocation5 + $0xa] sm:$0x3] }
  0x15   :  { %v968_v20 = vld [vmem:[%s1415_s0] sm:$0xff]  ;;  %v991_v28 = vld [vmem:[#allocation5 + $0x8] sm:$0x3]  ;;  %v1012_v36 = vld [vmem:[#allocation5 + $0x12] sm:$0x3]  ;;  %s660_s22 = sshll.u32 %s1420_s5, 4  ;;  %s661_s22 = int_to_ptr.hbm [resolvable:$true] %s660_s22 }
  0x16   :  { %v64_v21 = vrot.slane %v968_v20, 5  ;;  %v982_v23 = vld [vmem:[%s1416_s1] sm:$0xff]  ;;  %1442 = vst [vmem:[#allocation14_spill] sm:$0xff] %v991_v28  ;;  %v1007_v33 = vld [vmem:[%s1415_s0 + $0x8] sm:$0xff]  ;;  %v1014_v37 = vld [vmem:[#allocation5 + $0x10] sm:$0x3] }
  0x17   :  { %152 = vrot.lane.b32.xlu2 %v871_v3, %s808_s3  ;;  %148 = vrot.lane.b32.xlu1 %v873_v4, %s808_s3  ;;  %v82_v24 = vrot.slane %v982_v23, 5  ;;  %v1423_v34 = vperm.slane %v1007_v33, 0  ;;  %v1016_v38 = vld [vmem:[#allocation5 + $0xe] sm:$0x3]  ;;  %v69_v42 = vrot.slane %v1007_v33, 3  ;;  %v60_v61 = vrot.slane %v968_v20, 1 }
  0x18   :  { %144 = vrot.lane.b32.xlu0 %v875_v5, %s808_s3  ;;  %v985_v25 = vperm.slane %v64_v21, 0  ;;  %1443 = vst [vmem:[#allocation15_spill] sm:$0xff] %v1016_v38  ;;  %v1021_v39 = vld [vmem:[%s1416_s1 + $0x8] sm:$0xff]  ;;  %v1041_v48 = vld [vmem:[#allocation5 + $0x18] sm:$0x3]  ;;  %v78_v62 = vrot.slane %v982_v23, 1 }
  0x19   :  { %v993_v29 = vperm.slane %v82_v24, 0  ;;  %v1422_v40 = vperm.slane %v1021_v39, 0  ;;  %v278_v41 = vmul.f32 %v1423_v34, %v883_v6  ;;  %v87_v45 = vrot.slane %v1021_v39, 3  ;;  %1444 = vst [vmem:[#allocation16_spill] sm:$0xff] %v1041_v48  ;;  %v1043_v49 = vld [vmem:[#allocation5 + $0x16] sm:$0x3] }
  0x1a   :  { %v275_v30 = vmul.f32 %v985_v25, %v871_v3  ;;  %v1037_v46 = vperm.slane %v69_v42, 0  ;;  %1445 = vst [vmem:[#allocation17_spill] sm:$0xff] %v1043_v49  ;;  %v1045_v50 = vld [vmem:[#allocation5 + $0x14] sm:$0x3]  ;;  %v1064_v58 = vld [vmem:[#allocation5 + $0x1e] sm:$0x3] }
  0x1b   :  { %1446 = vst [vmem:[#allocation18_spill] sm:$0xff] %v1045_v50  ;;  %v1047_v51 = vperm.slane %v87_v45, 0  ;;  %v1066_v59 = vld [vmem:[#allocation5 + $0x1c] sm:$0x3]  ;;  %v1068_v60 = vld [vmem:[#allocation5 + $0x1a] sm:$0x3] }
  0x1c   :  { %v281_v52 = vmul.f32 %v1037_v46, %v895_v9  ;;  %1448 = vst [vmem:[#allocation20_spill] sm:$0xff] %v1068_v60  ;;  %v1079_v63 = vld [vmem:[%s1417_s2] sm:$0xff]  ;;  %v1089_v24 = vperm.slane %v78_v62, 0  ;;  %v84_v34 = vrot.slane %v982_v23, 7  ;;  %s811_s5 = smov [#allocation8]   ;;  %s673_s26 = sshll.u32 %s1421_s6, 4  ;;  %s674_s26 = int_to_ptr.hbm [resolvable:$true] %s673_s26 }
  0x1d   :  { %1447 = vst [vmem:[#allocation19_spill] sm:$0xff] %v1047_v51  ;;  %v99_v62 = vrot.slane %v1079_v63, 4  ;;  %s671_s23 = sshll.u32 %s811_s5, 4  ;;  %s672_s23 = int_to_ptr.vmem [resolvable:$true] %s671_s23 }
  0x1e   :  { %1449 = vst [vmem:[#allocation21_spill] sm:$0xff] %v1089_v24 }
  0x1f   :  { %158 = vrot.lane.b32.xlu2 %v883_v6, %s808_s3  ;;  %156 = vrot.lane.b32.xlu1 %v885_v7, %s808_s3 }
  0x20   :  { %154 = vrot.lane.b32.xlu0 %v887_v8, %s808_s3 }
  0x27   :  { %164 = vrot.lane.b32.xlu2 %v895_v9, %s808_s3  ;;  %162 = vrot.lane.b32.xlu1 %v897_v10, %s808_s3 }
  0x28   :  { %160 = vrot.lane.b32.xlu0 %v899_v11, %s808_s3 }
  0x2f   :  { %170 = vrot.lane.b32.xlu2 %v907_v12, %s808_s3  ;;  %168 = vrot.lane.b32.xlu1 %v909_v13, %s808_s3 }
  0x30   :  { %166 = vrot.lane.b32.xlu0 %v911_v14, %s808_s3 }
  0x37   :  { %192 = vrot.lane.b32.xlu2 %v875_v5, %s809_s4  ;;  %190 = vrot.lane.b32.xlu1 %v867_v2, %s809_s4 }
  0x38   :  { %172 = vrot.lane.b32.xlu0 %v919_v15, %s808_s3 }
  0x3f   :  { %198 = vrot.lane.b32.xlu2 %v859_v0, %s809_s4  ;;  %196 = vrot.lane.b32.xlu1 %v873_v4, %s809_s4 }
  0x40   :  { %194 = vrot.lane.b32.xlu0 %v861_v1, %s809_s4 }
  0x47   :  { %204 = vrot.lane.b32.xlu2 %v885_v7, %s809_s4  ;;  %202 = vrot.lane.b32.xlu1 %v887_v8, %s809_s4 }
  0x48   :  { %200 = vrot.lane.b32.xlu0 %v871_v3, %s809_s4 }
  0x4f   :  { %210 = vrot.lane.b32.xlu2 %v897_v10, %s809_s4  ;;  %208 = vrot.lane.b32.xlu1 %v899_v11, %s809_s4 }
  0x50   :  { %206 = vrot.lane.b32.xlu0 %v883_v6, %s809_s4 }
  0x57   :  { %216 = vrot.lane.b32.xlu2 %v909_v13, %s809_s4  ;;  %214 = vrot.lane.b32.xlu1 %v911_v14, %s809_s4 }
  0x58   :  { %212 = vrot.lane.b32.xlu0 %v895_v9, %s809_s4  ;;  %v1087_v9 = vperm.slane %v60_v61, 0 }
  0x5f   :  { %462 = vrot.lane.b32.xlu2 %v951_v16, %s808_s3  ;;  %220 = vrot.lane.b32.xlu1 %v919_v15, %s809_s4 }
  0x60   :  { %218 = vrot.lane.b32.xlu0 %v907_v12, %s809_s4 }
  0x67   :  { %468 = vrot.lane.b32.xlu2 %v959_v17, %s808_s3  ;;  %466 = vrot.lane.b32.xlu1 %v961_v18, %s808_s3 }
  0x68   :  { %464 = vrot.lane.b32.xlu0 %v963_v19, %s808_s3 }
  0x69   :  { %v977_v22 = vpop.permute.xlu2 %150 }
  0x6f   :  { %474 = vrot.lane.b32.xlu2 %v987_v26, %s808_s3  ;;  %472 = vrot.lane.b32.xlu1 %v989_v27, %s808_s3 }
  0x70   :  { %470 = vrot.lane.b32.xlu0 %v991_v28, %s808_s3 }
  0x71   :  { %v153_v31 = vpop.permute.xlu2 %152 }
  0x72   :  { %v323_v32 = vmul.f32 %v993_v29, %v153_v31  ;;  %v63_v31 = vrot.slane %v968_v20, 4 }
  0x74   :  { %v1010_v35 = vadd.f32 %v323_v32, %v275_v30  ;;  %v96_v30 = vrot.slane %v1079_v63, 1  ;;  %v271_v32 = vmul.f32 %v1087_v9, %v875_v5 }
  0x77   :  { %480 = vrot.lane.b32.xlu2 %v1012_v36, %s808_s3  ;;  %478 = vrot.lane.b32.xlu1 %v1014_v37, %s808_s3 }
  0x78   :  { %476 = vrot.lane.b32.xlu0 %v1016_v38, %s808_s3 }
  0x79   :  { %v159_v43 = vpop.permute.xlu2 %158 }
  0x7a   :  { %v326_v44 = vmul.f32 %v1422_v40, %v159_v43  ;;  %v1097_v43 = vperm.slane %v96_v30, 0  ;;  %v66_v30 = vrot.slane %v968_v20, 7 }
  0x7c   :  { %v1039_v47 = vadd.f32 %v326_v44, %v278_v41  ;;  %v81_v41 = vrot.slane %v982_v23, 4  ;;  %1450 = vst [vmem:[#allocation22_spill] sm:$0xff] %v1097_v43  ;;  %v1105_v44 = vperm.slane %v63_v31, 0 }
  0x7e   :  { %1451 = vst [vmem:[#allocation23_spill] sm:$0xff] %v1105_v44  ;;  %v1107_v5 = vperm.slane %v81_v41, 0  ;;  %v274_v40 = vmul.f32 %v1105_v44, %v859_v0  ;;  %v1119_v41 = vperm.slane %v99_v62, 0  ;;  %v102_v62 = vrot.slane %v1079_v63, 7 }
  0x7f   :  { %486 = vrot.lane.b32.xlu2 %v1041_v48, %s808_s3  ;;  %484 = vrot.lane.b32.xlu1 %v1043_v49, %s808_s3  ;;  %v86_v44 = vrot.slane %v1021_v39, 2 }
  0x80   :  { %482 = vrot.lane.b32.xlu0 %v1045_v50, %s808_s3  ;;  %1452 = vst [vmem:[#allocation24_spill] sm:$0xff] %v1107_v5  ;;  %v322_v31 = vmul.f32 %v1107_v5, %v977_v22  ;;  %v1129_v22 = vperm.slane %v84_v34, 0  ;;  %v68_v5 = vrot.slane %v1007_v33, 2  ;;  %v1149_v34 = vld [vmem:[%s1417_s2 + $0x8] sm:$0xff]  ;;  %s810_s2 = smov [#allocation7]  }
  0x81   :  { %v165_v53 = vpop.permute.xlu2 %164  ;;  %v1057_v54 = vpop.permute.xlu1 %146  ;;  %1453 = vst [vmem:[#allocation25_spill] sm:$0xff] %v1119_v41  ;;  %s658_s19 = sshll.u32 %s810_s2, 4  ;;  %s659_s19 = int_to_ptr.vmem [resolvable:$true] %s658_s19 }
  0x82   :  { %v329_v55 = vmul.f32 %v1047_v51, %v165_v53  ;;  %v1060_v56 = vpop.permute.xlu0 %142  ;;  %1455 = vst [vmem:[#allocation27_spill] sm:$0xff] %v1129_v22 }
  0x84   :  { %v1062_v57 = vadd.f32 %v329_v55, %v281_v52 }
  0x87   :  { %492 = vrot.lane.b32.xlu2 %v1064_v58, %s808_s3  ;;  %490 = vrot.lane.b32.xlu1 %v1066_v59, %s808_s3 }
  0x88   :  { %488 = vrot.lane.b32.xlu0 %v1068_v60, %s808_s3 }
  0x89   :  { %v1083_v3 = vpop.permute.xlu2 %170  ;;  %v1085_v6 = vpop.permute.xlu1 %148 }
  0x8a   :  { %v145_v21 = vpop.permute.xlu0 %144 }
  0x8b   :  { %v319_v42 = vmul.f32 %v1089_v24, %v145_v21  ;;  %v98_v24 = vrot.slane %v1079_v63, 3 }
  0x8d   :  { %v335_v53 = vadd.f32 %v319_v42, %v271_v32  ;;  %v1127_v32 = vperm.slane %v66_v30, 0 }
  0x8f   :  { %514 = vrot.lane.b32.xlu2 %v961_v18, %s809_s4  ;;  %512 = vrot.lane.b32.xlu1 %v963_v19, %s809_s4  ;;  %1454 = vst [vmem:[#allocation26_spill] sm:$0xff] %v1127_v32 }
  0x90   :  { %510 = vrot.lane.b32.xlu0 %v951_v16, %s809_s4 }
  0x91   :  { %v157_v45 = vpop.permute.xlu1 %156  ;;  %v193_v52 = vpop.permute.xlu2 %192 }
  0x92   :  { %v383_v55 = vmul.f32 %v1097_v43, %v193_v52  ;;  %v1110_v61 = vpop.permute.xlu0 %154  ;;  %v338_v52 = vadd.f32 %v322_v31, %v274_v40  ;;  %v325_v30 = vmul.f32 %v1129_v22, %v157_v45  ;;  %v1140_v40 = vperm.slane %v102_v62, 0 }
  0x93   :  { %v1154_v45 = vperm.slane %v68_v5, 0  ;;  %v1157_v62 = vperm.slane %v86_v44, 0  ;;  %v1459_v5 = vperm.slane %v968_v20, 0 }
  0x94   :  { %v399_v21 = vadd.f32 %v383_v55, %v335_v53  ;;  %1456 = vst [vmem:[#allocation28_spill] sm:$0xff] %v1140_v40 }
  0x95   :  { %1457 = vst [vmem:[#allocation29_spill] sm:$0xff] %v1154_v45  ;;  %v270_v31 = vmul.f32 %v1459_v5, %v867_v2  ;;  %v61_v2 = vrot.slane %v968_v20, 2 }
  0x96   :  { %415 = vst [vmem:[#allocation7 + $0x2] sm:$0x3] %v399_v21 }
  0x97   :  { %520 = vrot.lane.b32.xlu2 %v989_v27, %s809_s4  ;;  %518 = vrot.lane.b32.xlu1 %v991_v28, %s809_s4  ;;  %v277_v28 = vmul.f32 %v1127_v32, %v885_v7  ;;  %1458 = vst [vmem:[#allocation30_spill] sm:$0xff] %v1157_v62  ;;  %v62_v32 = vrot.slane %v968_v20, 3 }
  0x98   :  { %516 = vrot.lane.b32.xlu0 %v959_v17, %s809_s4 }
  0x99   :  { %v163_v0 = vpop.permute.xlu1 %162  ;;  %v199_v42 = vpop.permute.xlu2 %198 }
  0x9a   :  { %v386_v53 = vmul.f32 %v1119_v41, %v199_v42  ;;  %v1132_v55 = vpop.permute.xlu0 %160  ;;  %v71_v41 = vrot.slane %v1007_v33, 5  ;;  %v328_v43 = vmul.f32 %v1157_v62, %v163_v0 }
  0x9c   :  { %v402_v21 = vadd.f32 %v386_v53, %v338_v52  ;;  %v341_v53 = vadd.f32 %v325_v30, %v277_v28  ;;  %v1460_v28 = vperm.slane %v982_v23, 0  ;;  %v80_v30 = vrot.slane %v982_v23, 3 }
  0x9e   :  { %418 = vst [vmem:[#allocation7 + $0x8] sm:$0x3] %v402_v21  ;;  %v318_v44 = vmul.f32 %v1460_v28, %v1060_v56  ;;  %v1185_v56 = vperm.slane %v62_v32, 0  ;;  %v1191_v0 = vperm.slane %v80_v30, 0  ;;  %v1462_v32 = vperm.slane %v1079_v63, 0 }
  0x9f   :  { %526 = vrot.lane.b32.xlu2 %v1014_v37, %s809_s4  ;;  %524 = vrot.lane.b32.xlu1 %v1016_v38, %s809_s4  ;;  %v104_v38 = vrot.slane %v1149_v34, 2 }
  0xa0   :  { %522 = vrot.lane.b32.xlu0 %v987_v26, %s809_s4 }
  0xa1   :  { %v169_v42 = vpop.permute.xlu1 %168  ;;  %v205_v52 = vpop.permute.xlu2 %204  ;;  %v1176_v51 = vperm.slane %v104_v38, 0  ;;  %v334_v38 = vadd.f32 %v318_v44, %v270_v31  ;;  %v97_v44 = vrot.slane %v1079_v63, 2 }
  0xa2   :  { %v389_v21 = vmul.f32 %v1140_v40, %v205_v52  ;;  %v1160_v22 = vpop.permute.xlu0 %166  ;;  %v89_v52 = vrot.slane %v1021_v39, 5  ;;  %v280_v40 = vmul.f32 %v1154_v45, %v897_v10  ;;  %v1187_v10 = vperm.slane %v71_v41, 0 }
  0xa4   :  { %v405_v7 = vadd.f32 %v389_v21, %v341_v53  ;;  %v79_v21 = vrot.slane %v982_v23, 2  ;;  %v107_v53 = vrot.slane %v1149_v34, 5  ;;  %v344_v62 = vadd.f32 %v328_v43, %v280_v40 }
  0xa5   :  { %v273_v43 = vmul.f32 %v1185_v56, %v873_v4  ;;  %v65_v40 = vrot.slane %v968_v20, 6 }
  0xa6   :  { %421 = vst [vmem:[#allocation7 + $0xe] sm:$0x3] %v405_v7  ;;  %v1193_v7 = vperm.slane %v89_v52, 0  ;;  %v1204_v31 = vperm.slane %v79_v21, 0 }
  0xa7   :  { %532 = vrot.lane.b32.xlu2 %v1043_v49, %s809_s4  ;;  %530 = vrot.lane.b32.xlu1 %v1045_v50, %s809_s4  ;;  %v1202_v49 = vperm.slane %v61_v2, 0  ;;  %v283_v2 = vmul.f32 %v1187_v10, %v909_v13  ;;  %v1228_v13 = vperm.slane %v97_v44, 0 }
  0xa8   :  { %528 = vrot.lane.b32.xlu0 %v1012_v36, %s809_s4  ;;  %1461 = vst [vmem:[#allocation31_spill] sm:$0xff] %v1193_v7  ;;  %v331_v21 = vmul.f32 %v1193_v7, %v169_v42 }
  0xa9   :  { %v211_v5 = vpop.permute.xlu2 %210  ;;  %v191_v28 = vpop.permute.xlu1 %190  ;;  %v272_v4 = vmul.f32 %v1202_v49, %v861_v1 }
  0xaa   :  { %v392_v45 = vmul.f32 %v1176_v51, %v211_v5  ;;  %v382_v50 = vmul.f32 %v1462_v32, %v191_v28  ;;  %v1199_v41 = vpop.permute.xlu0 %172  ;;  %v321_v5 = vmul.f32 %v1191_v0, %v1085_v6  ;;  %v83_v28 = vrot.slane %v982_v23, 6 }
  0xab   :  { %v1216_v32 = vperm.slane %v107_v53, 0  ;;  %v1232_v6 = vperm.slane %v65_v40, 0 }
  0xac   :  { %v408_v30 = vadd.f32 %v392_v45, %v344_v62  ;;  %v398_v52 = vadd.f32 %v382_v50, %v334_v38  ;;  %v1218_v45 = vperm.slane %v98_v24, 0  ;;  %v320_v50 = vmul.f32 %v1204_v31, %v1057_v54 }
  0xad   :  { %v337_v24 = vadd.f32 %v321_v5, %v273_v43  ;;  %v1234_v42 = vperm.slane %v83_v28, 0  ;;  %v347_v54 = vadd.f32 %v331_v21, %v283_v2  ;;  %v67_v43 = vrot.slane %v1007_v33, 1 }
  0xae   :  { %424 = vst [vmem:[#allocation7 + $0x14] sm:$0x3] %v408_v30  ;;  %v336_v44 = vadd.f32 %v320_v50, %v272_v4  ;;  %v85_v5 = vrot.slane %v1021_v39, 1  ;;  %v276_v2 = vmul.f32 %v1232_v6, %v887_v8  ;;  %v1463_v50 = vperm.slane %v968_v20, 0 }
  0xaf   :  { %414 = vst [vmem:[#allocation7] sm:$0x3] %v398_v52  ;;  %538 = vrot.lane.b32.xlu2 %v1066_v59, %s809_s4  ;;  %536 = vrot.lane.b32.xlu1 %v1068_v60, %s809_s4  ;;  %v101_v52 = vrot.slane %v1079_v63, 6  ;;  %v324_v21 = vmul.f32 %v1234_v42, %v1110_v61  ;;  %v103_v20 = vrot.slane %v1149_v34, 1 }
  0xb0   :  { %534 = vrot.lane.b32.xlu0 %v1041_v48, %s809_s4  ;;  %v100_v48 = vrot.slane %v1079_v63, 5  ;;  %v1258_v8 = vperm.slane %v85_v5, 0 }
  0xb1   :  { %v217_v1 = vpop.permute.xlu2 %216  ;;  %v197_v62 = vpop.permute.xlu1 %196 }
  0xb2   :  { %v395_v53 = vmul.f32 %v1216_v32, %v217_v1  ;;  %v385_v38 = vmul.f32 %v1218_v45, %v197_v62  ;;  %v195_v30 = vpop.permute.xlu0 %194  ;;  %v1247_v1 = vperm.slane %v101_v52, 0  ;;  %v1249_v4 = vperm.slane %v100_v48, 0 }
  0xb3   :  { %v384_v7 = vmul.f32 %v1228_v13, %v195_v30  ;;  %v327_v5 = vmul.f32 %v1258_v8, %v1132_v55 }
  0xb4   :  { %v411_v40 = vadd.f32 %v395_v53, %v347_v54  ;;  %v401_v60 = vadd.f32 %v385_v38, %v337_v24  ;;  %v558_v24 = vmul.f32 %v951_v16, %v1463_v50  ;;  %v340_v54 = vadd.f32 %v324_v21, %v276_v2 }
  0xb5   :  { %v400_v28 = vadd.f32 %v384_v7, %v336_v44  ;;  %v1256_v7 = vperm.slane %v67_v43, 0  ;;  %v1464_v53 = vperm.slane %v982_v23, 0  ;;  %v70_v44 = vrot.slane %v1007_v33, 4 }
  0xb6   :  { %427 = vst [vmem:[#allocation7 + $0x1a] sm:$0x3] %v411_v40  ;;  %v88_v40 = vrot.slane %v1021_v39, 4  ;;  %v358_v2 = vperm.slane %v1149_v34, 0  ;;  %v561_v21 = vmul.f32 %v959_v17, %v1185_v56 }
  0xb7   :  { %417 = vst [vmem:[#allocation7 + $0x6] sm:$0x3] %v401_v60  ;;  %v279_v23 = vmul.f32 %v1256_v7, %v899_v11  ;;  %v1279_v50 = vperm.slane %v70_v44, 0 }
  0xb8   :  { %416 = vst [vmem:[#allocation7 + $0x4] sm:$0x3] %v400_v28  ;;  %540 = vrot.lane.b32.xlu0 %v1064_v58, %s809_s4  ;;  %v1274_v28 = vperm.slane %v103_v20, 0  ;;  %v91_v20 = vrot.slane %v1021_v39, 7 }
  0xb9   :  { %v463_v62 = vpop.permute.xlu2 %462  ;;  %v203_v61 = vpop.permute.xlu1 %202 }
  0xba   :  { %v574_v60 = vmul.f32 %v463_v62, %v1464_v53  ;;  %v388_v48 = vmul.f32 %v1247_v1, %v203_v61  ;;  %v201_v38 = vpop.permute.xlu0 %200  ;;  %v343_v61 = vadd.f32 %v327_v5, %v279_v23  ;;  %v106_v53 = vrot.slane %v1149_v34, 4 }
  0xbb   :  { %v387_v16 = vmul.f32 %v1249_v4, %v201_v38  ;;  %v73_v38 = vrot.slane %v1007_v33, 7  ;;  %v564_v5 = vmul.f32 %v987_v26, %v1232_v6  ;;  %v108_v26 = vrot.slane %v1149_v34, 6 }
  0xbc   :  { %v1265_v30 = vadd.f32 %v574_v60, %v558_v24  ;;  %v404_v52 = vadd.f32 %v388_v48, %v340_v54  ;;  %v1281_v24 = vperm.slane %v88_v40, 0  ;;  %v105_v48 = vrot.slane %v1149_v34, 3 }
  0xbd   :  { %v403_v43 = vadd.f32 %v387_v16, %v1010_v35  ;;  %v1298_v44 = vperm.slane %v106_v53, 0  ;;  %v72_v40 = vrot.slane %v1007_v33, 6 }
  0xbe   :  { %420 = vst [vmem:[#allocation7 + $0xc] sm:$0x3] %v404_v52  ;;  %v330_v52 = vmul.f32 %v1281_v24, %v1160_v22  ;;  %v1302_v23 = vperm.slane %v105_v48, 0 }
  0xbf   :  { %419 = vst [vmem:[#allocation7 + $0xa] sm:$0x3] %v403_v43  ;;  %v90_v43 = vrot.slane %v1021_v39, 6 }
  0xc1   :  { %v469_v35 = vpop.permute.xlu2 %468  ;;  %v209_v62 = vpop.permute.xlu1 %208  ;;  %v1313_v53 = vperm.slane %v90_v43, 0 }
  0xc2   :  { %v577_v11 = vmul.f32 %v469_v35, %v1191_v0  ;;  %v391_v55 = vmul.f32 %v1274_v28, %v209_v62  ;;  %v207_v54 = vpop.permute.xlu0 %206  ;;  %v282_v0 = vmul.f32 %v1279_v50, %v911_v14 }
  0xc3   :  { %v390_v60 = vmul.f32 %v358_v2, %v207_v54  ;;  %v1311_v54 = vperm.slane %v72_v40, 0 }
  0xc4   :  { %v1289_v17 = vadd.f32 %v577_v11, %v561_v21  ;;  %v407_v56 = vadd.f32 %v391_v55, %v343_v61  ;;  %v301_v21 = vperm.slane %v91_v20, 0  ;;  %v346_v62 = vadd.f32 %v330_v52, %v282_v0 }
  0xc5   :  { %v406_v16 = vadd.f32 %v390_v60, %v1039_v47  ;;  %v1306_v47 = vperm.slane %v73_v38, 0  ;;  %v109_v55 = vrot.slane %v1149_v34, 7  ;;  %v332_v0 = vmul.f32 %v1313_v53, %v1083_v3 }
  0xc6   :  { %423 = vst [vmem:[#allocation7 + $0x12] sm:$0x3] %v407_v56  ;;  %v333_v38 = vmul.f32 %v301_v21, %v1199_v41  ;;  %v1329_v52 = vperm.slane %v108_v26, 0 }
  0xc7   :  { %422 = vst [vmem:[#allocation7 + $0x10] sm:$0x3] %v406_v16  ;;  %v1323_v20 = vperm.slane %v109_v55, 0  ;;  %v284_v16 = vmul.f32 %v1311_v54, %v907_v12 }
  0xc9   :  { %v475_v14 = vpop.permute.xlu2 %474  ;;  %v215_v35 = vpop.permute.xlu1 %214  ;;  %v348_v12 = vadd.f32 %v332_v0, %v284_v16 }
  0xca   :  { %v580_v22 = vmul.f32 %v475_v14, %v1234_v42  ;;  %v394_v61 = vmul.f32 %v1298_v44, %v215_v35  ;;  %v213_v11 = vpop.permute.xlu0 %212  ;;  %v285_v42 = vmul.f32 %v1306_v47, %v919_v15 }
  0xcb   :  { %v393_v60 = vmul.f32 %v1302_v23, %v213_v11 }
  0xcc   :  { %v1317_v6 = vadd.f32 %v580_v22, %v564_v5  ;;  %v410_v48 = vadd.f32 %v394_v61, %v346_v62  ;;  %v349_v15 = vadd.f32 %v333_v38, %v285_v42 }
  0xcd   :  { %v409_v56 = vadd.f32 %v393_v60, %v1062_v57  ;;  %v567_v57 = vmul.f32 %v1012_v36, %v1256_v7 }
  0xce   :  { %426 = vst [vmem:[#allocation7 + $0x18] sm:$0x3] %v410_v48  ;;  %v560_v48 = vmul.f32 %v961_v18, %v1202_v49 }
  0xcf   :  { %425 = vst [vmem:[#allocation7 + $0x16] sm:$0x3] %v409_v56 }
  0xd1   :  { %v481_v40 = vpop.permute.xlu2 %480  ;;  %v221_v43 = vpop.permute.xlu1 %220 }
  0xd2   :  { %v583_v41 = vmul.f32 %v481_v40, %v1258_v8  ;;  %v397_v5 = vmul.f32 %v1323_v20, %v221_v43  ;;  %v219_v14 = vpop.permute.xlu0 %218 }
  0xd3   :  { %v396_v3 = vmul.f32 %v1329_v52, %v219_v14 }
  0xd4   :  { %v1339_v35 = vadd.f32 %v583_v41, %v567_v57  ;;  %v413_v36 = vadd.f32 %v397_v5, %v349_v15  ;;  %v1465_v5 = vperm.slane %v1007_v33, 0 }
  0xd5   :  { %v412_v7 = vadd.f32 %v396_v3, %v348_v12 }
  0xd6   :  { %429 = vst [vmem:[#allocation7 + $0x1e] sm:$0x3] %v413_v36  ;;  %v566_v14 = vmul.f32 %v1014_v37, %v1465_v5 }
  0xd7   :  { %428 = vst [vmem:[#allocation7 + $0x1c] sm:$0x3] %v412_v7 }
  0xd8   :  { %666 = dma.vmem_to_hbm [thread:$0]  %s659_s19, 512, %s661_s22, [#allocation4], %s805_s29, %s805_s29, %s806_s30  }
  0xd9   :  { %v487_v8 = vpop.permute.xlu2 %486  ;;  %v467_v62 = vpop.permute.xlu1 %466 }
  0xda   :  { %v1345_v22 = vmul.f32 %v487_v8, %v1281_v24  ;;  %v465_v61 = vpop.permute.xlu0 %464  ;;  %v576_v56 = vmul.f32 %v467_v62, %v1204_v31  ;;  %v563_v24 = vmul.f32 %v989_v27, %v985_v25  ;;  %v1467_v8 = vld [vmem:[#allocation17_spill] sm:$0xff] }
  0xdb   :  { %v569_v33 = vmul.f32 %v1467_v8, %v1037_v46  ;;  %v1468_v62 = vld [vmem:[#allocation21_spill] sm:$0xff] }
  0xdc   :  { %v592_v16 = vadd.f32 %v576_v56, %v560_v48  ;;  %v575_v37 = vmul.f32 %v465_v61, %v1468_v62  ;;  %v1472_v61 = vld [vmem:[#allocation23_spill] sm:$0xff] }
  0xe1   :  { %v493_v11 = vpop.permute.xlu2 %492  ;;  %v473_v55 = vpop.permute.xlu1 %472 }
  0xe2   :  { %v1347_v60 = vmul.f32 %v493_v11, %v301_v21  ;;  %v471_v26 = vpop.permute.xlu0 %470  ;;  %v579_v43 = vmul.f32 %v473_v55, %v993_v29  ;;  %v1469_v11 = vld [vmem:[#allocation19_spill] sm:$0xff] }
  0xe4   :  { %v595_v41 = vadd.f32 %v579_v43, %v563_v24  ;;  %v1473_v24 = vld [vmem:[#allocation14_spill] sm:$0xff] }
  0xe5   :  { %v562_v43 = vmul.f32 %v1473_v24, %v1472_v61 }
  0xe9   :  { %v515_v42 = vpop.permute.xlu2 %514  ;;  %v479_v38 = vpop.permute.xlu1 %478 }
  0xea   :  { %v608_v0 = vmul.f32 %v515_v42, %v1228_v13  ;;  %v477_v57 = vpop.permute.xlu0 %476  ;;  %v1466_v13 = vperm.slane %v1021_v39, 0 }
  0xec   :  { %v624_v40 = vadd.f32 %v608_v0, %v592_v16  ;;  %v582_v12 = vmul.f32 %v479_v38, %v1466_v13  ;;  %v1471_v0 = vperm.slane %v1079_v63, 0 }
  0xee   :  { %640 = vst [vmem:[#allocation8 + $0x4] sm:$0x3] %v624_v40  ;;  %v598_v27 = vadd.f32 %v582_v12, %v566_v14 }
  0xf1   :  { %v521_v21 = vpop.permute.xlu2 %520  ;;  %v485_v15 = vpop.permute.xlu1 %484 }
  0xf2   :  { %v611_v18 = vmul.f32 %v521_v21, %v1249_v4  ;;  %v483_v49 = vpop.permute.xlu0 %482  ;;  %v559_v4 = vmul.f32 %v963_v19, %v1087_v9  ;;  %v585_v39 = vmul.f32 %v485_v15, %v1469_v11  ;;  %v572_v21 = vmul.f32 %v1066_v59, %v1311_v54  ;;  %v1474_v15 = vld [vmem:[#allocation24_spill] sm:$0xff] }
  0xf4   :  { %v627_v31 = vadd.f32 %v611_v18, %v595_v41  ;;  %v591_v56 = vadd.f32 %v575_v37, %v559_v4  ;;  %v601_v42 = vadd.f32 %v585_v39, %v569_v33  ;;  %v578_v41 = vmul.f32 %v471_v26, %v1474_v15  ;;  %v1476_v26 = vld [vmem:[#allocation26_spill] sm:$0xff]  ;;  %v1480_v39 = vld [vmem:[#allocation29_spill] sm:$0xff] }
  0xf6   :  { %643 = vst [vmem:[#allocation8 + $0xa] sm:$0x3] %v627_v31  ;;  %v594_v31 = vadd.f32 %v578_v41, %v562_v43 }
  0xf9   :  { %v527_v3 = vpop.permute.xlu2 %526  ;;  %v491_v25 = vpop.permute.xlu1 %490 }
  0xfa   :  { %v614_v29 = vmul.f32 %v527_v3, %v358_v2  ;;  %v489_v36 = vpop.permute.xlu0 %488  ;;  %v1470_v2 = vld [vmem:[#allocation22_spill] sm:$0xff] }
  0xfc   :  { %v630_v7 = vadd.f32 %v614_v29, %v598_v27  ;;  %v1478_v29 = vld [vmem:[#allocation27_spill] sm:$0xff] }
  0xfe   :  { %646 = vst [vmem:[#allocation8 + $0x10] sm:$0x3] %v630_v7  ;;  %v581_v7 = vmul.f32 %v477_v57, %v1478_v29 }
 0x101   :  { %v533_v55 = vpop.permute.xlu2 %532  ;;  %v513_v48 = vpop.permute.xlu1 %512 }
 0x102   :  { %v617_v34 = vmul.f32 %v533_v55, %v1302_v23  ;;  %v607_v38 = vmul.f32 %v513_v48, %v1470_v2  ;;  %v511_v16 = vpop.permute.xlu0 %510  ;;  %v588_v23 = vmul.f32 %v491_v25, %v1313_v53  ;;  %v1477_v53 = vld [vmem:[#allocation15_spill] sm:$0xff]  ;;  %v1482_v48 = vld [vmem:[#allocation30_spill] sm:$0xff] }
 0x103   :  { %v606_v19 = vmul.f32 %v511_v16, %v1471_v0  ;;  %v565_v25 = vmul.f32 %v1477_v53, %v1476_v26  ;;  %v1483_v0 = vld [vmem:[#allocation20_spill] sm:$0xff] }
 0x104   :  { %v633_v9 = vadd.f32 %v617_v34, %v601_v42  ;;  %v623_v40 = vadd.f32 %v607_v38, %v591_v56  ;;  %v604_v5 = vadd.f32 %v588_v23, %v572_v21  ;;  %v584_v56 = vmul.f32 %v483_v49, %v1482_v48  ;;  %v1485_v49 = vld [vmem:[#allocation16_spill] sm:$0xff] }
 0x105   :  { %v622_v46 = vadd.f32 %v606_v19, %v1265_v30  ;;  %v1475_v30 = vld [vmem:[#allocation25_spill] sm:$0xff]  ;;  %v597_v8 = vadd.f32 %v581_v7, %v565_v25  ;;  %v1484_v19 = vld [vmem:[#allocation31_spill] sm:$0xff] }
 0x106   :  { %649 = vst [vmem:[#allocation8 + $0x16] sm:$0x3] %v633_v9  ;;  %v587_v9 = vmul.f32 %v489_v36, %v1484_v19 }
 0x107   :  { %639 = vst [vmem:[#allocation8 + $0x2] sm:$0x3] %v623_v40  ;;  %v570_v40 = vmul.f32 %v1485_v49, %v1279_v50 }
 0x108   :  { %638 = vst [vmem:[#allocation8] sm:$0x3] %v622_v46 }
 0x109   :  { %v539_v18 = vpop.permute.xlu2 %538  ;;  %v519_v63 = vpop.permute.xlu1 %518 }
 0x10a   :  { %v620_v14 = vmul.f32 %v539_v18, %v1329_v52  ;;  %v610_v13 = vmul.f32 %v519_v63, %v1475_v30  ;;  %v517_v12 = vpop.permute.xlu0 %516  ;;  %v1479_v52 = vld [vmem:[#allocation28_spill] sm:$0xff] }
 0x10b   :  { %v609_v3 = vmul.f32 %v517_v12, %v1218_v45 }
 0x10c   :  { %v636_v27 = vadd.f32 %v620_v14, %v604_v5  ;;  %v626_v59 = vadd.f32 %v610_v13, %v594_v31 }
 0x10d   :  { %v625_v54 = vadd.f32 %v609_v3, %v1289_v17  ;;  %v1481_v17 = vld [vmem:[#allocation18_spill] sm:$0xff] }
 0x10e   :  { %652 = vst [vmem:[#allocation8 + $0x1c] sm:$0x3] %v636_v27  ;;  %v568_v55 = vmul.f32 %v1481_v17, %v1480_v39 }
 0x10f   :  { %642 = vst [vmem:[#allocation8 + $0x8] sm:$0x3] %v626_v59 }
 0x110   :  { %641 = vst [vmem:[#allocation8 + $0x6] sm:$0x3] %v625_v54  ;;  %v600_v42 = vadd.f32 %v584_v56, %v568_v55 }
 0x111   :  { %v525_v4 = vpop.permute.xlu1 %524 }
 0x112   :  { %v613_v33 = vmul.f32 %v525_v4, %v1479_v52  ;;  %v523_v62 = vpop.permute.xlu0 %522 }
 0x113   :  { %v612_v37 = vmul.f32 %v523_v62, %v1247_v1 }
 0x114   :  { %v629_v45 = vadd.f32 %v613_v33, %v597_v8 }
 0x115   :  { %v628_v11 = vadd.f32 %v612_v37, %v1317_v6  ;;  %v571_v6 = vmul.f32 %v1483_v0, %v1187_v10  ;;  %v573_v10 = vmul.f32 %v1064_v58, %v1306_v47 }
 0x116   :  { %645 = vst [vmem:[#allocation8 + $0xe] sm:$0x3] %v629_v45 }
 0x117   :  { %644 = vst [vmem:[#allocation8 + $0xc] sm:$0x3] %v628_v11  ;;  %v603_v61 = vadd.f32 %v587_v9, %v571_v6 }
 0x119   :  { %v531_v57 = vpop.permute.xlu1 %530 }
 0x11a   :  { %v616_v34 = vmul.f32 %v531_v57, %v1176_v51  ;;  %v529_v2 = vpop.permute.xlu0 %528 }
 0x11b   :  { %v615_v38 = vmul.f32 %v529_v2, %v1274_v28  ;;  %v602_v28 = vadd.f32 %v1345_v22, %v570_v40 }
 0x11c   :  { %v632_v16 = vadd.f32 %v616_v34, %v600_v42 }
 0x11d   :  { %v631_v1 = vadd.f32 %v615_v38, %v1339_v35 }
 0x11e   :  { %648 = vst [vmem:[#allocation8 + $0x14] sm:$0x3] %v632_v16 }
 0x11f   :  { %647 = vst [vmem:[#allocation8 + $0x12] sm:$0x3] %v631_v1 }
 0x121   :  { %v537_v46 = vpop.permute.xlu1 %536 }
 0x122   :  { %v619_v51 = vmul.f32 %v537_v46, %v1216_v32  ;;  %v535_v24 = vpop.permute.xlu0 %534  ;;  %v605_v32 = vadd.f32 %v1347_v60, %v573_v10 }
 0x123   :  { %v618_v43 = vmul.f32 %v535_v24, %v1298_v44 }
 0x124   :  { %v635_v35 = vadd.f32 %v619_v51, %v603_v61 }
 0x125   :  { %v634_v21 = vadd.f32 %v618_v43, %v602_v28 }
 0x126   :  { %651 = vst [vmem:[#allocation8 + $0x1a] sm:$0x3] %v635_v35 }
 0x127   :  { %650 = vst [vmem:[#allocation8 + $0x18] sm:$0x3] %v634_v21 }
 0x12a   :  { %v541_v36 = vpop.permute.xlu0 %540 }
 0x12b   :  { %v621_v50 = vmul.f32 %v541_v36, %v1323_v20 }
 0x12d   :  { %v637_v22 = vadd.f32 %v621_v50, %v605_v32 }
 0x12f   :  { %653 = vst [vmem:[#allocation8 + $0x1e] sm:$0x3] %v637_v22 }
 0x130   :  { %679 = dma.vmem_to_hbm [thread:$0]  %s672_s23, 512, %s674_s26, [#allocation9], %s805_s29, %s805_s29, %s806_s30  }
 0x131   :  { %800 = dma.done.wait [#allocation4], 512  }
 0x132   :  { %801 = vsyncadd [#allocation4], 4294966784 }
 0x133   :  { %802 = dma.done.wait [#allocation9], 512  }
 0x134   :  { %803 = vsyncadd [#allocation9], 4294966784 }
 0x135   :  { %688 = vsyncpa [#allocation3], 1 }
 0x136   :  { %689 = vsyncpa [#allocation6], 1 }
 0x137   :  { %690 = vsyncpa [#allocation4], 1 }
 0x138   :  { %691 = vsyncpa [#allocation9], 1 }

</bundles_post_ra>
